<compile_context>
chip_gen: v6e
topology: v6e:2x2x1
jax: 0.10.0
libtpu: 0.0.40
codegen_flags: <defaults>
</compile_context>

<pallas_src>
import functools

import jax
import jax.numpy as jnp
from jax.experimental import pallas as pl
from jax.experimental.pallas import tpu as pltpu


def _round_up(a: int, b: int) -> int:
    return (a + b - 1) // b * b


def _cdiv(a: int, b: int) -> int:
    return (a + b - 1) // b


def _sublane_pack(dtype) -> int:
    # Packed min-tile sublane count: 8 for 4-byte, 16 for 2-byte, 32 for 1-byte.
    return max(8, 32 // jnp.dtype(dtype).itemsize)


def _vmem_cap_bytes() -> int:
    """~80% of this generation's physical VMEM (v5e/v6e 128 MiB, v7x 64 MiB)."""
    try:
        capacity = int(pltpu.get_tpu_info().vmem_capacity_bytes)
    except Exception:
        capacity = 64 << 20  # conservative fallback (v7x-sized)
    return int(capacity * 0.8)


# ---------------------------------------------------------------------------
# Kernels
# ---------------------------------------------------------------------------

def _td_linear_full_k_kernel(x_ref, w_ref, b_ref, o_ref, *, compute_dtype):
    """One (tm, n_pad) output tile: in-kernel cast, full-K MXU dot, f32 bias."""
    x = x_ref[...].astype(compute_dtype)
    w = w_ref[...].astype(compute_dtype)
    acc = jnp.dot(x, w, preferred_element_type=jnp.float32)
    o_ref[...] = (acc + b_ref[...]).astype(o_ref.dtype)


def _td_linear_k_tiled_kernel(x_ref, w_ref, b_ref, o_ref, acc_ref, *, compute_dtype):
    """Large-K fallback: K grid axis with a resident f32 accumulator."""
    k = pl.program_id(1)

    @pl.when(k == 0)
    def _():
        acc_ref[...] = jnp.zeros_like(acc_ref)

    x = x_ref[...].astype(compute_dtype)
    w = w_ref[...].astype(compute_dtype)
    acc_ref[...] += jnp.dot(x, w, preferred_element_type=jnp.float32)

    @pl.when(k == pl.num_programs(1) - 1)
    def _():
        o_ref[...] = (acc_ref[...] + b_ref[...]).astype(o_ref.dtype)


# ---------------------------------------------------------------------------
# One-time parameter prep (hoisted out of the per-call path)
# ---------------------------------------------------------------------------

def prepare_td_linear_params(w, b, compute_dtype=None):
    """Transpose, lane-pad and (optionally) cast the Linear params once.

    w : (hidden, in_features)  -- torch.nn.Linear weight layout
    b : (hidden,)
    Returns (w_p (in_features, n_pad), b2d (1, n_pad) f32).
    """
    hidden, _ = w.shape
    n_pad = _round_up(hidden, 128)
    w_t = w.T  # (in_features, hidden)
    if n_pad != hidden:
        w_t = jnp.pad(w_t, ((0, 0), (0, n_pad - hidden)))
        b = jnp.pad(b, (0, n_pad - hidden))
    if compute_dtype is not None:
        w_t = w_t.astype(compute_dtype)
    b2d = b.reshape(1, n_pad).astype(jnp.float32)  # bias added in f32
    return w_t, b2d


# ---------------------------------------------------------------------------
# TimeDistributed(Linear) forward
# ---------------------------------------------------------------------------

@functools.partial(jax.jit, static_argnames=("hidden", "tm", "compute_dtype"))
def time_distributed_linear(x, w_p, b2d, *, hidden, tm=1024, compute_dtype=None):
    """TimeDistributed(Flatten + Linear)(x).

    x    : (bs, seq_len, C, H, W)
    w_p  : (C*H*W, n_pad)  -- from prepare_td_linear_params
    b2d  : (1, n_pad) f32  -- from prepare_td_linear_params
    returns (bs, seq_len, hidden) in x.dtype
    """
    orig_dtype = x.dtype
    bs, seq_len = x.shape[0], x.shape[1]
    k_dim = 1
    for d in x.shape[2:]:
        k_dim *= d
    n_pad = w_p.shape[1]
    if compute_dtype is None:
        compute_dtype = x.dtype  # preserve the module's numerics by default

    # --- TimeDistributed "forward" glue: fuse batch & time dims -------------
    m = bs * seq_len
    x2d = x.reshape(m, k_dim)

    x_itemsize = jnp.dtype(x.dtype).itemsize
    w_itemsize = jnp.dtype(w_p.dtype).itemsize
    cd_itemsize = jnp.dtype(compute_dtype).itemsize
    out_itemsize = jnp.dtype(orig_dtype).itemsize

    # Sublane packing across every dtype touched by a tile.
    pack = max(_sublane_pack(x.dtype), _sublane_pack(compute_dtype),
               _sublane_pack(orig_dtype))

    # --- M tiling: big tiles, but >=2 tiles when possible (v7x megacore) ----
    if m <= tm:
        tm_eff = max(pack, _round_up(_cdiv(m, 2), pack))
        tm_eff = min(tm_eff, _round_up(m, pack))
    else:
        tm_eff = _round_up(tm, pack)
    min_tm = max(pack, 256)

    vmem_cap = _vmem_cap_bytes()

    def fast_vmem_bytes(tm_):
        return (2 * tm_ * k_dim * x_itemsize        # x tiles (double-buffered)
                + 1 * k_dim * n_pad * w_itemsize    # weight (resident, 1 buffer)
                + 2 * tm_ * n_pad * out_itemsize    # output tiles
                + n_pad * 4                         # bias (resident, 1 buffer)
                + tm_ * k_dim * cd_itemsize         # in-kernel cast copy of x
                + tm_ * n_pad * 4                   # f32 acc before output cast
                + (4 << 20))                        # headroom

    use_fast = fast_vmem_bytes(tm_eff) <= vmem_cap
    while (not use_fast) and tm_eff > min_tm:
        tm_eff = max(min_tm, _round_up(tm_eff // 2, pack))
        use_fast = fast_vmem_bytes(tm_eff) <= vmem_cap

    cost = pl.CostEstimate(
        flops=2 * m * k_dim * hidden,
        transcendentals=0,
        bytes_accessed=(m * k_dim * x_itemsize
                        + k_dim * n_pad * w_itemsize
                        + m * n_pad * out_itemsize),
    )

    if use_fast:
        # -------- Fast path: full-K resident weight, M-only parallel grid ---
        grid = (_cdiv(m, tm_eff),)
        kernel = functools.partial(_td_linear_full_k_kernel,
                                   compute_dtype=compute_dtype)
        vmem_limit = min(max(fast_vmem_bytes(tm_eff), 32 << 20), vmem_cap)
        out2d = pl.pallas_call(
            kernel,
            out_shape=jax.ShapeDtypeStruct((m, n_pad), orig_dtype),
            grid_spec=pltpu.PrefetchScalarGridSpec(
                num_scalar_prefetch=0,
                grid=grid,
                in_specs=[
                    pl.BlockSpec((tm_eff, k_dim), lambda i: (i, 0)),   # x tile
                    pl.BlockSpec((k_dim, n_pad), lambda i: (0, 0),     # weight
                                 pipeline_mode=pl.Buffered(1)),
                    pl.BlockSpec((1, n_pad), lambda i: (0, 0),         # bias
                                 pipeline_mode=pl.Buffered(1)),
                ],
                out_specs=pl.BlockSpec((tm_eff, n_pad), lambda i: (i, 0)),
            ),
            compiler_params=pltpu.CompilerParams(
                dimension_semantics=("parallel",),
                vmem_limit_bytes=vmem_limit,
            ),
            cost_estimate=cost,
        )(x2d, w_p, b2d)
    else:
        # -------- Large-K fallback: K grid axis + f32 accumulator scratch ---
        tk = 512

        def ktiled_vmem_bytes(tm_, tk_):
            return (2 * tm_ * tk_ * x_itemsize
                    + 2 * tk_ * n_pad * w_itemsize
                    + 2 * tm_ * n_pad * out_itemsize
                    + tm_ * n_pad * 4                # f32 accumulator scratch
                    + n_pad * 4
                    + tm_ * tk_ * cd_itemsize
                    + (4 << 20))

        while ktiled_vmem_bytes(tm_eff, tk) > vmem_cap and tm_eff > min_tm:
            tm_eff = max(min_tm, _round_up(tm_eff // 2, pack))
        while ktiled_vmem_bytes(tm_eff, tk) > vmem_cap and tk > 128:
            tk = max(128, tk // 2)

        k_pad = _round_up(k_dim, tk)
        x_k, w_k = x2d, w_p
        if k_pad != k_dim:
            # TODO(synk): zero-padding K here adds an extra pass over x; only
            # hit in the large-K fallback regime — pre-pad weights at init and
            # mask the ragged K tile in-kernel to avoid it.
            x_k = jnp.pad(x2d, ((0, 0), (0, k_pad - k_dim)))
            w_k = jnp.pad(w_p, ((0, k_pad - k_dim), (0, 0)))

        grid = (_cdiv(m, tm_eff), k_pad // tk)
        kernel = functools.partial(_td_linear_k_tiled_kernel,
                                   compute_dtype=compute_dtype)
        vmem_limit = min(max(ktiled_vmem_bytes(tm_eff, tk), 32 << 20), vmem_cap)
        out2d = pl.pallas_call(
            kernel,
            out_shape=jax.ShapeDtypeStruct((m, n_pad), orig_dtype),
            grid_spec=pltpu.PrefetchScalarGridSpec(
                num_scalar_prefetch=0,
                grid=grid,
                in_specs=[
                    pl.BlockSpec((tm_eff, tk), lambda i, k: (i, k)),   # x tile
                    pl.BlockSpec((tk, n_pad), lambda i, k: (k, 0)),    # w tile
                    pl.BlockSpec((1, n_pad), lambda i, k: (0, 0),      # bias
                                 pipeline_mode=pl.Buffered(1)),
                ],
                out_specs=pl.BlockSpec((tm_eff, n_pad), lambda i, k: (i, 0)),
                scratch_shapes=[pltpu.VMEM((tm_eff, n_pad), jnp.float32)],
            ),
            compiler_params=pltpu.CompilerParams(
                dimension_semantics=("parallel", "arbitrary"),
                vmem_limit_bytes=vmem_limit,
            ),
            cost_estimate=cost,
        )(x_k, w_k, b2d)

    # --- TimeDistributed "format_output": un-fuse batch & time dims ---------
    # TODO(synk): a fused consumer could take the lane-padded (m, n_pad) slab
    # directly and skip this slice (saves one small XLA copy pass).
    out2d = out2d[:, :hidden]
    return out2d.reshape(bs, seq_len, hidden)


if __name__ == "__main__":
    # Small shapes consistent with the module: (bs, seq_len, C, H, W)
    bs, seq_len, C, H, W = 2, 8, 4, 16, 16
    hidden = 32
    in_features = C * H * W  # 1024

    key = jax.random.PRNGKey(0)
    kx, kw, kb = jax.random.split(key, 3)

    x = jax.random.normal(kx, (bs, seq_len, C, H, W), dtype=jnp.float32)

    # torch.nn.Linear-style params: weight (out, in), bias (out,)
    bound = 1.0 / (in_features ** 0.5)
    w = jax.random.uniform(
        kw, (hidden, in_features), minval=-bound, maxval=bound, dtype=jnp.float32
    )
    b = jax.random.uniform(
        kb, (hidden,), minval=-bound, maxval=bound, dtype=jnp.float32
    )

    # Pure-JAX reference of the same TimeDistributed(Linear) semantics.
    ref = (x.reshape(bs * seq_len, in_features) @ w.T + b).reshape(
        bs, seq_len, hidden
    )

    # Default path: compute dtype == input dtype (f32), tight check.
    w_f32, b2d = prepare_td_linear_params(w, b)          # hoisted, once
    out_f32 = jax.block_until_ready(
        time_distributed_linear(x, w_f32, b2d, hidden=hidden)
    )
    assert out_f32.shape == (bs, seq_len, hidden)
    assert jnp.allclose(out_f32, ref, atol=1e-3, rtol=1e-3)

    # Opt-in bf16 MXU path: weight pre-cast once, x cast in-kernel (f32 DMA).
    w_bf16, b2d_bf = prepare_td_linear_params(w, b, compute_dtype=jnp.bfloat16)
    out_bf16 = jax.block_until_ready(
        time_distributed_linear(
            x, w_bf16, b2d_bf, hidden=hidden, compute_dtype=jnp.bfloat16
        )
    )
    assert out_bf16.shape == (bs, seq_len, hidden)
    assert jnp.allclose(out_bf16, ref, atol=3e-2, rtol=3e-2)

    print("KERNEL_OK")
</pallas_src>

<mosaic_0001>
module attributes {stable_mosaic.version = 11 : i64} {
  func.func @_td_linear_full_k_kernel(%arg0: i32, %arg1: memref<8x1024xf32, #tpu.memory_space<vmem>>, %arg2: memref<1024x128xf32, #tpu.memory_space<vmem>>, %arg3: memref<1x128xf32, #tpu.memory_space<vmem>>, %arg4: memref<8x128xf32, #tpu.memory_space<vmem>>) attributes {dimension_semantics = [#tpu.dimension_semantics<parallel>], iteration_bounds = array<i64: 2>, scalar_prefetch = 0 : i64, scratch_operands = 0 : i64, tpu.core_type = #tpu.core_type<tc>, window_params = [{transform_indices = @transform_0, window_bounds = array<i64: 8, 1024>}, {pipeline_mode = #tpu.pipeline_mode<synchronous>, transform_indices = @transform_1, window_bounds = array<i64: 1024, 128>}, {pipeline_mode = #tpu.pipeline_mode<synchronous>, transform_indices = @transform_2, window_bounds = array<i64: 1, 128>}, {transform_indices = @transform_3, window_bounds = array<i64: 8, 128>}]} {
    %c0 = arith.constant 0 : index
    %c0_0 = arith.constant 0 : index
    %0 = vector.load %arg1[%c0, %c0_0] : memref<8x1024xf32, #tpu.memory_space<vmem>>, vector<8x1024xf32>
    %c0_1 = arith.constant 0 : index
    %c0_2 = arith.constant 0 : index
    %1 = vector.load %arg2[%c0_1, %c0_2] : memref<1024x128xf32, #tpu.memory_space<vmem>>, vector<1024x128xf32>
    %cst = arith.constant dense<0.000000e+00> : vector<8x128xf32>
    %2 = tpu.matmul %0, %1, %cst {dimension_numbers = #tpu.dot_dimension_numbers<[1], [0], [0], [1], [0, 0, 1, 1], [], []>} : vector<8x1024xf32>, vector<1024x128xf32>, vector<8x128xf32> -> vector<8x128xf32>
    %c0_3 = arith.constant 0 : index
    %c0_4 = arith.constant 0 : index
    %3 = vector.load %arg3[%c0_3, %c0_4] : memref<1x128xf32, #tpu.memory_space<vmem>>, vector<1x128xf32>
    %4 = vector.broadcast %3 : vector<1x128xf32> to vector<8x128xf32>
    %5 = arith.addf %2, %4 : vector<8x128xf32>
    %c0_5 = arith.constant 0 : index
    %c0_6 = arith.constant 0 : index
    %6 = vector.load %arg4[%c0_5, %c0_6] : memref<8x128xf32, #tpu.memory_space<vmem>>, vector<8x128xf32>
    tpu.vector_store %arg4[%c0_5, %c0_6], %5 {strides = array<i32>} : memref<8x128xf32, #tpu.memory_space<vmem>>, vector<8x128xf32>,
    return
  }
  func.func @transform_0(%arg0: i32) -> (i32, i32) {
    %c0_i32 = arith.constant 0 : i32
    %c0_i32_0 = arith.constant 0 : i32
    return %arg0, %c0_i32 : i32, i32
  }
  func.func @transform_1(%arg0: i32) -> (i32, i32) {
    %c0_i32 = arith.constant 0 : i32
    %c0_i32_0 = arith.constant 0 : i32
    %c0_i32_1 = arith.constant 0 : i32
    return %c0_i32, %c0_i32_0 : i32, i32
  }
  func.func @transform_2(%arg0: i32) -> (i32, i32) {
    %c0_i32 = arith.constant 0 : i32
    %c0_i32_0 = arith.constant 0 : i32
    %c0_i32_1 = arith.constant 0 : i32
    return %c0_i32, %c0_i32_0 : i32, i32
  }
  func.func @transform_3(%arg0: i32) -> (i32, i32) {
    %c0_i32 = arith.constant 0 : i32
    %c0_i32_0 = arith.constant 0 : i32
    return %arg0, %c0_i32 : i32, i32
  }
}

</mosaic_0001>

<bundles_post_ra>
// kernel: time_distributed_linear.1
= control target key start
LH: loop header
LB: loop body
LE: loop exit
PB: predicated region body
PF: predicated region fallthrough
CT: control target
= control target key end

     0   :  { %s834_s12 = smov 0   ;;  %s1262_s0 = inlined_call_operand.vmem [shape: f32[16,1024], index: 0, kind: input, shape index: {}]   ;;  %s1263_s1 = inlined_call_operand.vmem [shape: f32[1024,128], index: 1, kind: input, shape index: {}]   ;;  %s1264_s2 = inlined_call_operand.vmem [shape: f32[1,128], index: 2, kind: input, shape index: {}]   ;;  %s1265_s3 = inlined_call_operand.vmem [shape: f32[16,128], index: 3, kind: output, shape index: {}]  }
   0x1 LB: > { %s646_s13 = sadd.s32 4294967295, %s812_s12   ;;  %p650_p0 = scmp.ge.s32.totalorder %s812_s12, 1  ;;  %s812_s12 = sphi %s834_s12, %s13_s12  }
   0x2   : > { %p137_p1 = scmp.lt.s32.totalorder %s812_s12, 3 }
   0x4   : > { %p138_p2 = pnand %p650_p0, %p137_p1 }
   0x5   : > { %p952_p3 = scmp.lt.s32.totalorder (!%p138_p2), %s646_s13, 1 }
   0x6   : > { %141 = sbr.rel (%p138_p2) target bundleno = 282 (0x11a), region = 32 }
   0xb   : > { %v208_v0 = vld [vmem:[%s1263_s1 + $0xf8] sm:$0xff]  ;;  %v207_v4 = vld [vmem:[%s1263_s1 + $0xf0] sm:$0xff]  ;;  %v206_v8 = vld [vmem:[%s1263_s1 + $0xe8] sm:$0xff]  ;;  %s1268_s13 = smov (!%p952_p3, %s646_s13), 1 }
   0xc   : > { %v240_v1 = vld [vmem:[%s1263_s1 + $0x1f8] sm:$0xff]  ;;  %658 = vmatprep.subr.mxu0 %v208_v0  ;;  %v239_v5 = vld [vmem:[%s1263_s1 + $0x1f0] sm:$0xff]  ;;  %v238_v9 = vld [vmem:[%s1263_s1 + $0x1e8] sm:$0xff]  ;;  %s657_s19 = sshll.u32 %s1268_s13, 6 }
   0xd   : > { %v192_v2 = vld [vmem:[%s1263_s1 + $0x78] sm:$0xff]  ;;  %693 = vmatprep.subr.mxu1 %v240_v1  ;;  %v191_v6 = vld [vmem:[%s1263_s1 + $0x70] sm:$0xff]  ;;  %v190_v10 = vld [vmem:[%s1263_s1 + $0x68] sm:$0xff]  ;;  %s1032_s7 = scalar_lea.vmem %s1262_s0, %s657_s19 }
   0xe   : > { %v224_v3 = vld [vmem:[%s1263_s1 + $0x178] sm:$0xff]  ;;  %659 = vmatpush3.msra.mxu0 %v192_v2  ;;  %v223_v7 = vld [vmem:[%s1263_s1 + $0x170] sm:$0xff]  ;;  %v222_v11 = vld [vmem:[%s1263_s1 + $0x168] sm:$0xff] }
   0xf   : > { %694 = vmatpush3.msra.mxu1 %v224_v3  ;;  %660 = vmatprep.subr.mxu0 %v207_v4  ;;  %v205_v12 = vld [vmem:[%s1263_s1 + $0xe0] sm:$0xff]  ;;  %v204_v16 = vld [vmem:[%s1263_s1 + $0xd8] sm:$0xff]  ;;  %v203_v20 = vld [vmem:[%s1263_s1 + $0xd0] sm:$0xff] }
  0x10   : > { %695 = vmatprep.subr.mxu1 %v239_v5  ;;  %661 = vmatpush3.msra.mxu0 %v191_v6  ;;  %v237_v13 = vld [vmem:[%s1263_s1 + $0x1e0] sm:$0xff]  ;;  %v236_v17 = vld [vmem:[%s1263_s1 + $0x1d8] sm:$0xff]  ;;  %v235_v21 = vld [vmem:[%s1263_s1 + $0x1d0] sm:$0xff] }
  0x11   : > { %696 = vmatpush3.msra.mxu1 %v223_v7  ;;  %662 = vmatprep.subr.mxu0 %v206_v8  ;;  %v189_v14 = vld [vmem:[%s1263_s1 + $0x60] sm:$0xff]  ;;  %v188_v18 = vld [vmem:[%s1263_s1 + $0x58] sm:$0xff]  ;;  %v187_v22 = vld [vmem:[%s1263_s1 + $0x50] sm:$0xff] }
  0x12   : > { %697 = vmatprep.subr.mxu1 %v238_v9  ;;  %v221_v15 = vld [vmem:[%s1263_s1 + $0x160] sm:$0xff]  ;;  %663 = vmatpush3.msra.mxu0 %v190_v10  ;;  %v220_v19 = vld [vmem:[%s1263_s1 + $0x158] sm:$0xff]  ;;  %v219_v23 = vld [vmem:[%s1263_s1 + $0x150] sm:$0xff] }
  0x13   : > { %698 = vmatpush3.msra.mxu1 %v222_v11  ;;  %664 = vmatprep.subr.mxu0 %v205_v12  ;;  %v202_v24 = vld [vmem:[%s1263_s1 + $0xc8] sm:$0xff]  ;;  %v201_v28 = vld [vmem:[%s1263_s1 + $0xc0] sm:$0xff]  ;;  %v200_v32 = vld [vmem:[%s1263_s1 + $0xb8] sm:$0xff] }
  0x14   : > { %699 = vmatprep.subr.mxu1 %v237_v13  ;;  %665 = vmatpush3.msra.mxu0 %v189_v14  ;;  %v234_v25 = vld [vmem:[%s1263_s1 + $0x1c8] sm:$0xff]  ;;  %v233_v29 = vld [vmem:[%s1263_s1 + $0x1c0] sm:$0xff]  ;;  %v232_v33 = vld [vmem:[%s1263_s1 + $0x1b8] sm:$0xff] }
  0x15   : > { %700 = vmatpush3.msra.mxu1 %v221_v15  ;;  %666 = vmatprep.subr.mxu0 %v204_v16  ;;  %v186_v26 = vld [vmem:[%s1263_s1 + $0x48] sm:$0xff]  ;;  %v185_v30 = vld [vmem:[%s1263_s1 + $0x40] sm:$0xff]  ;;  %v184_v34 = vld [vmem:[%s1263_s1 + $0x38] sm:$0xff] }
  0x16   : > { %701 = vmatprep.subr.mxu1 %v236_v17  ;;  %667 = vmatpush3.msra.mxu0 %v188_v18  ;;  %v218_v27 = vld [vmem:[%s1263_s1 + $0x148] sm:$0xff]  ;;  %v217_v31 = vld [vmem:[%s1263_s1 + $0x140] sm:$0xff]  ;;  %v216_v35 = vld [vmem:[%s1263_s1 + $0x138] sm:$0xff] }
  0x17   : > { %702 = vmatpush3.msra.mxu1 %v220_v19  ;;  %668 = vmatprep.subr.mxu0 %v203_v20  ;;  %v199_v36 = vld [vmem:[%s1263_s1 + $0xb0] sm:$0xff]  ;;  %v198_v40 = vld [vmem:[%s1263_s1 + $0xa8] sm:$0xff]  ;;  %v197_v44 = vld [vmem:[%s1263_s1 + $0xa0] sm:$0xff] }
  0x18   : > { %703 = vmatprep.subr.mxu1 %v235_v21  ;;  %669 = vmatpush3.msra.mxu0 %v187_v22  ;;  %v231_v37 = vld [vmem:[%s1263_s1 + $0x1b0] sm:$0xff]  ;;  %v230_v41 = vld [vmem:[%s1263_s1 + $0x1a8] sm:$0xff]  ;;  %v229_v45 = vld [vmem:[%s1263_s1 + $0x1a0] sm:$0xff] }
  0x19   : > { %704 = vmatpush3.msra.mxu1 %v219_v23  ;;  %670 = vmatprep.subr.mxu0 %v202_v24  ;;  %v183_v38 = vld [vmem:[%s1263_s1 + $0x30] sm:$0xff]  ;;  %v182_v42 = vld [vmem:[%s1263_s1 + $0x28] sm:$0xff]  ;;  %v181_v46 = vld [vmem:[%s1263_s1 + $0x20] sm:$0xff] }
  0x1a   : > { %705 = vmatprep.subr.mxu1 %v234_v25  ;;  %671 = vmatpush3.msra.mxu0 %v186_v26  ;;  %v215_v39 = vld [vmem:[%s1263_s1 + $0x130] sm:$0xff]  ;;  %v214_v43 = vld [vmem:[%s1263_s1 + $0x128] sm:$0xff]  ;;  %v213_v47 = vld [vmem:[%s1263_s1 + $0x120] sm:$0xff] }
  0x1b   : > { %706 = vmatpush3.msra.mxu1 %v218_v27  ;;  %672 = vmatprep.subr.mxu0 %v201_v28  ;;  %v196_v48 = vld [vmem:[%s1263_s1 + $0x98] sm:$0xff]  ;;  %v195_v52 = vld [vmem:[%s1263_s1 + $0x90] sm:$0xff]  ;;  %v194_v56 = vld [vmem:[%s1263_s1 + $0x88] sm:$0xff] }
  0x1c   : > { %707 = vmatprep.subr.mxu1 %v233_v29  ;;  %673 = vmatpush3.msra.mxu0 %v185_v30  ;;  %v228_v49 = vld [vmem:[%s1263_s1 + $0x198] sm:$0xff]  ;;  %v227_v53 = vld [vmem:[%s1263_s1 + $0x190] sm:$0xff]  ;;  %v226_v57 = vld [vmem:[%s1263_s1 + $0x188] sm:$0xff] }
  0x1d   : > { %708 = vmatpush3.msra.mxu1 %v217_v31  ;;  %674 = vmatprep.subr.mxu0 %v200_v32  ;;  %v180_v50 = vld [vmem:[%s1263_s1 + $0x18] sm:$0xff]  ;;  %v179_v54 = vld [vmem:[%s1263_s1 + $0x10] sm:$0xff]  ;;  %v178_v58 = vld [vmem:[%s1263_s1 + $0x8] sm:$0xff] }
  0x1e   : > { %709 = vmatprep.subr.mxu1 %v232_v33  ;;  %675 = vmatpush3.msra.mxu0 %v184_v34  ;;  %v212_v51 = vld [vmem:[%s1263_s1 + $0x118] sm:$0xff]  ;;  %v211_v55 = vld [vmem:[%s1263_s1 + $0x110] sm:$0xff]  ;;  %v210_v59 = vld [vmem:[%s1263_s1 + $0x108] sm:$0xff] }
  0x1f   : > { %710 = vmatpush3.msra.mxu1 %v216_v35  ;;  %676 = vmatprep.subr.mxu0 %v199_v36  ;;  %v193_v60 = vld [vmem:[%s1263_s1 + $0x80] sm:$0xff]  ;;  %v170_v63 = vld [vmem:[%s1032_s7 + $0x8] sm:$0xff]  ;;  %v172_v2 = vld [vmem:[%s1032_s7 + $0x18] sm:$0xff] }
  0x20   : > { %711 = vmatprep.subr.mxu1 %v231_v37  ;;  %677 = vmatpush3.msra.mxu0 %v183_v38  ;;  %v225_v61 = vld [vmem:[%s1263_s1 + $0x180] sm:$0xff]  ;;  %v272_v3 = vld [vmem:[%s1263_s1 + $0x2f8] sm:$0xff]  ;;  %v171_v5 = vld [vmem:[%s1032_s7 + $0x10] sm:$0xff] }
  0x21   : > { %712 = vmatpush3.msra.mxu1 %v215_v39  ;;  %678 = vmatprep.subr.mxu0 %v198_v40  ;;  %v177_v62 = vld [vmem:[%s1263_s1] sm:$0xff]  ;;  %v304_v4 = vld [vmem:[%s1263_s1 + $0x3f8] sm:$0xff]  ;;  %v271_v8 = vld [vmem:[%s1263_s1 + $0x2f0] sm:$0xff] }
  0x22   : > { %713 = vmatprep.subr.mxu1 %v230_v41  ;;  %679 = vmatpush3.msra.mxu0 %v182_v42  ;;  %v209_v0 = vld [vmem:[%s1263_s1 + $0x100] sm:$0xff]  ;;  %v256_v6 = vld [vmem:[%s1263_s1 + $0x278] sm:$0xff]  ;;  %v303_v9 = vld [vmem:[%s1263_s1 + $0x3f0] sm:$0xff] }
  0x23   : > { %714 = vmatpush3.msra.mxu1 %v214_v43  ;;  %680 = vmatprep.subr.mxu0 %v197_v44  ;;  %v169_v1 = vld [vmem:[%s1032_s7] sm:$0xff]  ;;  %v288_v7 = vld [vmem:[%s1263_s1 + $0x378] sm:$0xff]  ;;  %v255_v10 = vld [vmem:[%s1263_s1 + $0x270] sm:$0xff] }
  0x24   : > { %715 = vmatprep.subr.mxu1 %v229_v45  ;;  %681 = vmatpush3.msra.mxu0 %v181_v46  ;;  %v287_v11 = vld [vmem:[%s1263_s1 + $0x370] sm:$0xff]  ;;  %v270_v12 = vld [vmem:[%s1263_s1 + $0x2e8] sm:$0xff]  ;;  %v269_v16 = vld [vmem:[%s1263_s1 + $0x2e0] sm:$0xff] }
  0x25   : > { %716 = vmatpush3.msra.mxu1 %v213_v47  ;;  %682 = vmatprep.subr.mxu0 %v196_v48  ;;  %v302_v13 = vld [vmem:[%s1263_s1 + $0x3e8] sm:$0xff]  ;;  %v301_v17 = vld [vmem:[%s1263_s1 + $0x3e0] sm:$0xff]  ;;  %v268_v20 = vld [vmem:[%s1263_s1 + $0x2d8] sm:$0xff] }
  0x26   : > { %717 = vmatprep.subr.mxu1 %v228_v49  ;;  %683 = vmatpush3.msra.mxu0 %v180_v50  ;;  %v254_v14 = vld [vmem:[%s1263_s1 + $0x268] sm:$0xff]  ;;  %v253_v18 = vld [vmem:[%s1263_s1 + $0x260] sm:$0xff]  ;;  %v300_v21 = vld [vmem:[%s1263_s1 + $0x3d8] sm:$0xff] }
  0x27   : > { %718 = vmatpush3.msra.mxu1 %v212_v51  ;;  %684 = vmatprep.subr.mxu0 %v195_v52  ;;  %v286_v15 = vld [vmem:[%s1263_s1 + $0x368] sm:$0xff]  ;;  %v285_v19 = vld [vmem:[%s1263_s1 + $0x360] sm:$0xff]  ;;  %v252_v22 = vld [vmem:[%s1263_s1 + $0x258] sm:$0xff] }
  0x28   : > { %719 = vmatprep.subr.mxu1 %v227_v53  ;;  %685 = vmatpush3.msra.mxu0 %v179_v54  ;;  %v284_v23 = vld [vmem:[%s1263_s1 + $0x358] sm:$0xff]  ;;  %v267_v24 = vld [vmem:[%s1263_s1 + $0x2d0] sm:$0xff]  ;;  %v266_v28 = vld [vmem:[%s1263_s1 + $0x2c8] sm:$0xff] }
  0x29   : > { %720 = vmatpush3.msra.mxu1 %v211_v55  ;;  %686 = vmatprep.subr.mxu0 %v194_v56  ;;  %v299_v25 = vld [vmem:[%s1263_s1 + $0x3d0] sm:$0xff]  ;;  %v298_v29 = vld [vmem:[%s1263_s1 + $0x3c8] sm:$0xff]  ;;  %v265_v32 = vld [vmem:[%s1263_s1 + $0x2c0] sm:$0xff] }
  0x2a   : > { %721 = vmatprep.subr.mxu1 %v226_v57  ;;  %687 = vmatpush3.msra.mxu0 %v178_v58  ;;  %v251_v26 = vld [vmem:[%s1263_s1 + $0x250] sm:$0xff]  ;;  %v250_v30 = vld [vmem:[%s1263_s1 + $0x248] sm:$0xff]  ;;  %v297_v33 = vld [vmem:[%s1263_s1 + $0x3c0] sm:$0xff] }
  0x2b   : > { %722 = vmatpush3.msra.mxu1 %v210_v59  ;;  %688 = vmatprep.subr.mxu0 %v193_v60  ;;  %v283_v27 = vld [vmem:[%s1263_s1 + $0x350] sm:$0xff]  ;;  %v282_v31 = vld [vmem:[%s1263_s1 + $0x348] sm:$0xff]  ;;  %v249_v34 = vld [vmem:[%s1263_s1 + $0x240] sm:$0xff] }
  0x2c   : > { %723 = vmatprep.subr.mxu1 %v225_v61  ;;  %689 = vmatpush3.msra.mxu0 %v177_v62  ;;  %v281_v35 = vld [vmem:[%s1263_s1 + $0x340] sm:$0xff]  ;;  %v264_v36 = vld [vmem:[%s1263_s1 + $0x2b8] sm:$0xff]  ;;  %v263_v40 = vld [vmem:[%s1263_s1 + $0x2b0] sm:$0xff] }
  0x2d   : > { %376 = vmatprep.mubr.f32.mxu0 %v170_v63  ;;  %724 = vmatpush3.msra.mxu1 %v209_v0  ;;  %v296_v37 = vld [vmem:[%s1263_s1 + $0x3b8] sm:$0xff]  ;;  %v295_v41 = vld [vmem:[%s1263_s1 + $0x3b0] sm:$0xff]  ;;  %v262_v44 = vld [vmem:[%s1263_s1 + $0x2a8] sm:$0xff] }
  0x2e   : > { %377 = vmatmul.mubr.f32.vlgmr.msra.gmra.mxu0 %v169_v1  ;;  %446 = vmatprep.mubr.f32.mxu1 %v172_v2  ;;  %v248_v38 = vld [vmem:[%s1263_s1 + $0x238] sm:$0xff]  ;;  %v247_v42 = vld [vmem:[%s1263_s1 + $0x230] sm:$0xff]  ;;  %v294_v45 = vld [vmem:[%s1263_s1 + $0x3a8] sm:$0xff] }
  0x2f   : > { %728 = vmatprep.subr.mxu0 %v272_v3  ;;  %763 = vmatprep.subr.mxu1 %v304_v4  ;;  %v280_v39 = vld [vmem:[%s1263_s1 + $0x338] sm:$0xff]  ;;  %v279_v43 = vld [vmem:[%s1263_s1 + $0x330] sm:$0xff]  ;;  %v246_v46 = vld [vmem:[%s1263_s1 + $0x228] sm:$0xff] }
  0x30   : > { %447 = vmatmul.mubr.f32.vlgmr.msra.gmra.mxu1 %v171_v5  ;;  %729 = vmatpush3.msra.mxu0 %v256_v6  ;;  %v278_v47 = vld [vmem:[%s1263_s1 + $0x328] sm:$0xff]  ;;  %v261_v48 = vld [vmem:[%s1263_s1 + $0x2a0] sm:$0xff]  ;;  %v260_v52 = vld [vmem:[%s1263_s1 + $0x298] sm:$0xff] }
  0x31   : > { %764 = vmatpush3.msra.mxu1 %v288_v7  ;;  %730 = vmatprep.subr.mxu0 %v271_v8  ;;  %v293_v49 = vld [vmem:[%s1263_s1 + $0x3a0] sm:$0xff]  ;;  %v292_v53 = vld [vmem:[%s1263_s1 + $0x398] sm:$0xff]  ;;  %v259_v56 = vld [vmem:[%s1263_s1 + $0x290] sm:$0xff] }
  0x32   : > { %765 = vmatprep.subr.mxu1 %v303_v9  ;;  %731 = vmatpush3.msra.mxu0 %v255_v10  ;;  %v245_v50 = vld [vmem:[%s1263_s1 + $0x220] sm:$0xff]  ;;  %v244_v54 = vld [vmem:[%s1263_s1 + $0x218] sm:$0xff]  ;;  %v291_v57 = vld [vmem:[%s1263_s1 + $0x390] sm:$0xff] }
  0x33   : > { %766 = vmatpush3.msra.mxu1 %v287_v11  ;;  %732 = vmatprep.subr.mxu0 %v270_v12  ;;  %v277_v51 = vld [vmem:[%s1263_s1 + $0x320] sm:$0xff]  ;;  %v276_v55 = vld [vmem:[%s1263_s1 + $0x318] sm:$0xff]  ;;  %v243_v58 = vld [vmem:[%s1263_s1 + $0x210] sm:$0xff] }
  0x34   : > { %767 = vmatprep.subr.mxu1 %v302_v13  ;;  %733 = vmatpush3.msra.mxu0 %v254_v14  ;;  %v275_v59 = vld [vmem:[%s1263_s1 + $0x310] sm:$0xff]  ;;  %v258_v60 = vld [vmem:[%s1263_s1 + $0x288] sm:$0xff]  ;;  %v257_v0 = vld [vmem:[%s1263_s1 + $0x280] sm:$0xff] }
  0x35   : > { %768 = vmatpush3.msra.mxu1 %v286_v15  ;;  %734 = vmatprep.subr.mxu0 %v269_v16  ;;  %v290_v61 = vld [vmem:[%s1263_s1 + $0x388] sm:$0xff]  ;;  %v289_v1 = vld [vmem:[%s1263_s1 + $0x380] sm:$0xff]  ;;  %v176_v5 = vld [vmem:[%s1032_s7 + $0x38] sm:$0xff] }
  0x36   : > { %769 = vmatprep.subr.mxu1 %v301_v17  ;;  %735 = vmatpush3.msra.mxu0 %v253_v18  ;;  %v242_v62 = vld [vmem:[%s1263_s1 + $0x208] sm:$0xff]  ;;  %v241_v2 = vld [vmem:[%s1263_s1 + $0x200] sm:$0xff]  ;;  %v175_v7 = vld [vmem:[%s1032_s7 + $0x30] sm:$0xff] }
  0x37   : > { %770 = vmatpush3.msra.mxu1 %v285_v19  ;;  %736 = vmatprep.subr.mxu0 %v268_v20  ;;  %v274_v63 = vld [vmem:[%s1263_s1 + $0x308] sm:$0xff]  ;;  %v273_v4 = vld [vmem:[%s1263_s1 + $0x300] sm:$0xff] }
  0x38   : > { %771 = vmatprep.subr.mxu1 %v300_v21  ;;  %737 = vmatpush3.msra.mxu0 %v252_v22  ;;  %v174_v3 = vld [vmem:[%s1032_s7 + $0x28] sm:$0xff]  ;;  %v173_v6 = vld [vmem:[%s1032_s7 + $0x20] sm:$0xff]  ;;  %s653_s7 = sshll.u32 %s1268_s13, 3 }
  0x39   : > { %772 = vmatpush3.msra.mxu1 %v284_v23  ;;  %738 = vmatprep.subr.mxu0 %v267_v24  ;;  %v654_v12 = vld [vmem:[%s1264_s2] ss:$0 sm:$0xff]  ;;  %s168_s8 = scalar_lea.vmem %s1265_s3, %s653_s7 }
  0x3a   : > { %773 = vmatprep.subr.mxu1 %v299_v25  ;;  %739 = vmatpush3.msra.mxu0 %v251_v26 }
  0x3b   : > { %774 = vmatpush3.msra.mxu1 %v283_v27  ;;  %740 = vmatprep.subr.mxu0 %v266_v28 }
  0x3c   : > { %775 = vmatprep.subr.mxu1 %v298_v29  ;;  %741 = vmatpush3.msra.mxu0 %v250_v30 }
  0x3d   : > { %776 = vmatpush3.msra.mxu1 %v282_v31  ;;  %742 = vmatprep.subr.mxu0 %v265_v32 }
  0x3e   : > { %777 = vmatprep.subr.mxu1 %v297_v33  ;;  %743 = vmatpush3.msra.mxu0 %v249_v34 }
  0x3f   : > { %778 = vmatpush3.msra.mxu1 %v281_v35  ;;  %744 = vmatprep.subr.mxu0 %v264_v36 }
  0x40   : > { %779 = vmatprep.subr.mxu1 %v296_v37  ;;  %745 = vmatpush3.msra.mxu0 %v248_v38 }
  0x41   : > { %780 = vmatpush3.msra.mxu1 %v280_v39  ;;  %746 = vmatprep.subr.mxu0 %v263_v40 }
  0x42   : > { %781 = vmatprep.subr.mxu1 %v295_v41  ;;  %747 = vmatpush3.msra.mxu0 %v247_v42 }
  0x43   : > { %782 = vmatpush3.msra.mxu1 %v279_v43  ;;  %748 = vmatprep.subr.mxu0 %v262_v44 }
  0x44   : > { %783 = vmatprep.subr.mxu1 %v294_v45  ;;  %749 = vmatpush3.msra.mxu0 %v246_v46 }
  0x45   : > { %784 = vmatpush3.msra.mxu1 %v278_v47  ;;  %750 = vmatprep.subr.mxu0 %v261_v48 }
  0x46   : > { %785 = vmatprep.subr.mxu1 %v293_v49  ;;  %751 = vmatpush3.msra.mxu0 %v245_v50 }
  0x47   : > { %786 = vmatpush3.msra.mxu1 %v277_v51  ;;  %752 = vmatprep.subr.mxu0 %v260_v52 }
  0x48   : > { %787 = vmatprep.subr.mxu1 %v292_v53  ;;  %753 = vmatpush3.msra.mxu0 %v244_v54 }
  0x49   : > { %788 = vmatpush3.msra.mxu1 %v276_v55  ;;  %754 = vmatprep.subr.mxu0 %v259_v56 }
  0x4a   : > { %789 = vmatprep.subr.mxu1 %v291_v57  ;;  %755 = vmatpush3.msra.mxu0 %v243_v58 }
  0x4b   : > { %790 = vmatpush3.msra.mxu1 %v275_v59  ;;  %756 = vmatprep.subr.mxu0 %v258_v60 }
  0x4c   : > { %791 = vmatprep.subr.mxu1 %v290_v61  ;;  %757 = vmatpush3.msra.mxu0 %v242_v62 }
  0x4d   : > { %792 = vmatpush3.msra.mxu1 %v274_v63  ;;  %758 = vmatprep.subr.mxu0 %v257_v0 }
  0x4e   : > { %793 = vmatprep.subr.mxu1 %v289_v1  ;;  %759 = vmatpush3.msra.mxu0 %v241_v2 }
  0x4f   : > { %516 = vmatprep.mubr.f32.mxu0 %v174_v3  ;;  %794 = vmatpush3.msra.mxu1 %v273_v4 }
  0x50   : > { %586 = vmatprep.mubr.f32.mxu1 %v176_v5  ;;  %517 = vmatmul.mubr.f32.vlgmr.msra.gmra.mxu0 %v173_v6 }
  0x51   : > { %587 = vmatmul.mubr.f32.vlgmr.msra.gmra.mxu1 %v175_v7 }
  0xee   : > { %v690_v8 = vpop.f32.mrf.mxu0 }
  0xf0   : > { %v725_v9 = vpop.f32.mrf.mxu1  ;;  %v691_v10 = vpop.f32.mrf.mxu0 }
  0xf1   : > { %v692_v11 = vadd.f32 %v691_v10, %v690_v8 }
  0xf2   : > { %v726_v13 = vpop.f32.mrf.mxu1 }
  0xf3   : > { %v379_v14 = vadd.f32 %v692_v11, %v654_v12  ;;  %v727_v15 = vadd.f32 %v726_v13, %v725_v9 }
  0xf5   : > { %v449_v20 = vadd.f32 %v727_v15, %v379_v14 }
 0x110   : > { %v760_v16 = vpop.f32.mrf.mxu0 }
 0x111   : > { %v795_v17 = vpop.f32.mrf.mxu1 }
 0x112   : > { %v761_v18 = vpop.f32.mrf.mxu0 }
 0x113   : > { %v796_v19 = vpop.f32.mrf.mxu1  ;;  %v762_v21 = vadd.f32 %v761_v18, %v760_v16 }
 0x114   : > { %v797_v23 = vadd.f32 %v796_v19, %v795_v17 }
 0x115   : > { %v519_v22 = vadd.f32 %v762_v21, %v449_v20 }
 0x117   : > { %v589_v24 = vadd.f32 %v797_v23, %v519_v22 }
 0x119   : > { %592 = vst [vmem:[%s168_s8] sm:$0xff] %v589_v24 }
 0x11a PF: > { %s13_s12 = sadd.s32 1, %s812_s12  }
 0x11b   : > { %p10_p4 = scmp.ge.s32.totalorder %s13_s12, 4  }
 0x11d   :  { %12 = sbr.rel (!%p10_p4) target bundleno = 1 (0x1), region = 62 }

</bundles_post_ra>
